<compile_context>
chip_gen: v5e
topology: v5e:2x2
jax: 0.10.0
libtpu: 0.0.40
codegen_flags: <defaults>
</compile_context>

<pallas_src>
import functools

import jax
import jax.numpy as jnp
from jax.experimental import pallas as pl
from jax.experimental.pallas import tpu as pltpu


def basic_block_kernel(x_ref, w1_ref, b1_ref, w2_ref, b2_ref, w3_ref, b3_ref,
                       m_ref, o_ref, *, H, W, C):
    HW = H * W

    # ---- conv1 (1x1) + folded BN1 + ReLU:  (C, Cin) @ (Cin, HW) ----
    t = jnp.dot(w1_ref[...], x_ref[0].astype(jnp.bfloat16),
                preferred_element_type=jnp.float32)
    t = jnp.maximum(t + b1_ref[...], 0.0)                         # (C, HW) f32

    # ---- 3x3 grouped conv (pad=1) as a single im2col matmul per layer ----
    def conv3x3(t_in, w_ref, b_ref, relu):
        cols = []
        for kh in range(3):
            for kw in range(3):
                d = (kh - 1) * W + (kw - 1)        # flat spatial offset of this tap
                shift = (-d) % HW                  # jnp.roll convention: out[p] = in[p + d]
                r = pltpu.roll(t_in, shift, axis=1) if shift else t_in
                cols.append(r * m_ref[kh * 3 + kw])   # zero out-of-image taps
        acols = jnp.concatenate(cols, axis=0).astype(jnp.bfloat16)  # (9C, HW)
        y = jnp.dot(w_ref[...], acols, preferred_element_type=jnp.float32)
        y = y + b_ref[...]                                          # folded BN shift
        return jnp.maximum(y, 0.0) if relu else y

    t = conv3x3(t, w2_ref, b2_ref, relu=True)
    t = conv3x3(t, w3_ref, b3_ref, relu=False)

    # ---- residual add (stride=1, downsample=None -> Cin == Cout) + ReLU ----
    o_ref[0] = jnp.maximum(t + x_ref[0], 0.0)      # residual re-read here (f32)


def fold_bn(gamma, beta, mean, var, conv_bias, eps=1e-5):
    """Return (scale, shift) as (C, 1) columns: BN(conv(x)+b) = scale*conv(x) + shift."""
    a = gamma / jnp.sqrt(var + eps)
    shift = beta + (conv_bias - mean) * a
    return a.reshape(-1, 1), shift.reshape(-1, 1)


def grouped_weight_cmajor(w, scale, groups):
    """PyTorch grouped-conv weight (Cout, Cin/g, 3, 3) -> channel-major im2col
    matrix (Cout, 9*Cin) with Wmat[o, k*Cin + i] = scale[o] * w[o, i_local, kh, kw],
    k = kh*3 + kw; entries outside the group's block are zero."""
    Cout, Cin_pg, KH, KW = w.shape
    Cin = Cin_pg * groups
    out_pg = Cout // groups
    Wmat = jnp.zeros((Cout, KH * KW * Cin), jnp.float32)
    for kh in range(KH):
        for kw in range(KW):
            k = kh * KW + kw
            for g in range(groups):
                blk = w[g * out_pg:(g + 1) * out_pg, :, kh, kw]   # (out_pg, Cin_pg)
                Wmat = Wmat.at[g * out_pg:(g + 1) * out_pg,
                               k * Cin + g * Cin_pg:k * Cin + (g + 1) * Cin_pg].set(blk)
    return Wmat * scale.reshape(-1, 1)


def make_tap_masks(H, W):
    """(9, 1, H*W) float masks: 1 where tap (kh, kw) stays inside the image."""
    hh = jnp.arange(H).reshape(H, 1)
    ww = jnp.arange(W).reshape(1, W)
    masks = []
    for kh in range(3):
        for kw in range(3):
            dh, dw = kh - 1, kw - 1
            m = ((hh + dh >= 0) & (hh + dh < H) &
                 (ww + dw >= 0) & (ww + dw < W))
            masks.append(m.reshape(1, H * W))
    return jnp.stack(masks, axis=0).astype(jnp.float32)


def basic_block_pallas(x_nchw, params, groups=4):
    B, Cin, H, W = x_nchw.shape
    C = params["w1"].shape[0]
    assert Cin == C, "downsample=None requires inplanes == planes * expansion"
    HW = H * W

    # Channel-major, lane-dense: NCHW -> (B, C, H*W) is a free reshape.
    x = x_nchw.reshape(B, Cin, HW).astype(jnp.float32)

    a1, b1 = fold_bn(params["g1"], params["be1"], params["m1"], params["v1"], params["b1c"])
    a2, b2 = fold_bn(params["g2"], params["be2"], params["m2"], params["v2"], params["b2c"])
    a3, b3 = fold_bn(params["g3"], params["be3"], params["m3"], params["v3"], params["b3c"])

    # BN scale folded into the weights; weights stored bf16 for the MXU.
    w1m = (params["w1"].reshape(C, Cin) * a1).astype(jnp.bfloat16)              # (C, Cin)
    w2m = grouped_weight_cmajor(params["w2"], a2, groups).astype(jnp.bfloat16)  # (C, 9C)
    w3m = grouped_weight_cmajor(params["w3"], a3, groups).astype(jnp.bfloat16)  # (C, 9C)
    masks = make_tap_masks(H, W)                                                # (9, 1, HW)

    full2 = lambda b: (0, 0)

    out = pl.pallas_call(
        functools.partial(basic_block_kernel, H=H, W=W, C=C),
        out_shape=jax.ShapeDtypeStruct((B, C, HW), jnp.float32),
        grid_spec=pltpu.PrefetchScalarGridSpec(
            num_scalar_prefetch=0,
            grid=(B,),
            in_specs=[
                pl.BlockSpec((1, Cin, HW), lambda b: (b, 0, 0)),   # x (lane-dense)
                pl.BlockSpec((C, Cin), full2),                     # w1 (scale folded)
                pl.BlockSpec((C, 1), full2),                       # shift1
                pl.BlockSpec((C, 9 * C), full2),                   # w2 im2col matrix
                pl.BlockSpec((C, 1), full2),                       # shift2
                pl.BlockSpec((C, 9 * C), full2),                   # w3 im2col matrix
                pl.BlockSpec((C, 1), full2),                       # shift3
                pl.BlockSpec((9, 1, HW), lambda b: (0, 0, 0)),     # boundary masks
            ],
            out_specs=pl.BlockSpec((1, C, HW), lambda b: (b, 0, 0)),
        ),
        compiler_params=pltpu.CompilerParams(dimension_semantics=("parallel",)),
    )(x, w1m, b1, w2m, b2, w3m, b3, masks)

    return out.reshape(B, C, H, W)                                  # directly NCHW


def basic_block_reference(x, params, groups=4, eps=1e-5):
    """Pure-JAX f32 reference (inference-mode BN), NCHW like PyTorch."""
    def conv(x, w, b, groups=1, pad=0):
        y = jax.lax.conv_general_dilated(
            x, w, (1, 1), [(pad, pad), (pad, pad)],
            dimension_numbers=("NCHW", "OIHW", "NCHW"),
            feature_group_count=groups)
        return y + b[None, :, None, None]

    def bn(x, gamma, beta, mean, var):
        a = gamma / jnp.sqrt(var + eps)
        return (x - mean[None, :, None, None]) * a[None, :, None, None] \
            + beta[None, :, None, None]

    residual = x
    out = jax.nn.relu(bn(conv(x, params["w1"], params["b1c"]),
                         params["g1"], params["be1"], params["m1"], params["v1"]))
    out = jax.nn.relu(bn(conv(out, params["w2"], params["b2c"], groups=groups, pad=1),
                         params["g2"], params["be2"], params["m2"], params["v2"]))
    out = bn(conv(out, params["w3"], params["b3c"], groups=groups, pad=1),
             params["g3"], params["be3"], params["m3"], params["v3"])
    return jax.nn.relu(out + residual)


if __name__ == "__main__":
    # Module config: planes=4, expansion=2 -> C=8; inplanes=8 so the residual
    # matches (downsample=None, stride=1); groups=4.
    inplanes, planes, expansion, groups = 8, 4, 2, 4
    C = planes * expansion
    B, H, W = 2, 16, 16

    key = jax.random.PRNGKey(0)
    ks = jax.random.split(key, 20)

    params = {
        "w1": jax.random.normal(ks[0], (C, inplanes, 1, 1), jnp.float32) / jnp.sqrt(inplanes),
        "b1c": 0.1 * jax.random.normal(ks[1], (C,), jnp.float32),
        "w2": jax.random.normal(ks[2], (C, C // groups, 3, 3), jnp.float32)
              / jnp.sqrt(9 * C // groups),
        "b2c": 0.1 * jax.random.normal(ks[3], (C,), jnp.float32),
        "w3": jax.random.normal(ks[4], (C, C // groups, 3, 3), jnp.float32)
              / jnp.sqrt(9 * C // groups),
        "b3c": 0.1 * jax.random.normal(ks[5], (C,), jnp.float32),
        # BN params (inference-mode running stats)
        "g1": 1.0 + 0.1 * jax.random.normal(ks[6], (C,), jnp.float32),
        "be1": 0.1 * jax.random.normal(ks[7], (C,), jnp.float32),
        "m1": 0.1 * jax.random.normal(ks[8], (C,), jnp.float32),
        "v1": 0.5 + jnp.abs(jax.random.normal(ks[9], (C,), jnp.float32)),
        "g2": 1.0 + 0.1 * jax.random.normal(ks[10], (C,), jnp.float32),
        "be2": 0.1 * jax.random.normal(ks[11], (C,), jnp.float32),
        "m2": 0.1 * jax.random.normal(ks[12], (C,), jnp.float32),
        "v2": 0.5 + jnp.abs(jax.random.normal(ks[13], (C,), jnp.float32)),
        "g3": 1.0 + 0.1 * jax.random.normal(ks[14], (C,), jnp.float32),
        "be3": 0.1 * jax.random.normal(ks[15], (C,), jnp.float32),
        "m3": 0.1 * jax.random.normal(ks[16], (C,), jnp.float32),
        "v3": 0.5 + jnp.abs(jax.random.normal(ks[17], (C,), jnp.float32)),
    }

    x = jax.random.normal(ks[18], (B, inplanes, H, W), jnp.float32)

    out = jax.block_until_ready(basic_block_pallas(x, params, groups=groups))
    ref = jax.block_until_ready(basic_block_reference(x, params, groups=groups))

    assert out.shape == (B, C, H, W), out.shape
    # bf16 matmul operands (f32 accumulation) vs. f32 reference -> bf16-level tolerance.
    assert jnp.allclose(out, ref, atol=4e-2, rtol=4e-2), \
        f"max abs diff = {jnp.max(jnp.abs(out - ref))}"

    print("KERNEL_OK")
</pallas_src>

<mosaic_0001>
module attributes {stable_mosaic.version = 11 : i64} {
  func.func @basic_block_kernel(%arg0: i32, %arg1: memref<1x8x256xf32, #tpu.memory_space<vmem>>, %arg2: memref<8x8xbf16, #tpu.memory_space<vmem>>, %arg3: memref<8x1xf32, #tpu.memory_space<vmem>>, %arg4: memref<8x72xbf16, #tpu.memory_space<vmem>>, %arg5: memref<8x1xf32, #tpu.memory_space<vmem>>, %arg6: memref<8x72xbf16, #tpu.memory_space<vmem>>, %arg7: memref<8x1xf32, #tpu.memory_space<vmem>>, %arg8: memref<9x1x256xf32, #tpu.memory_space<vmem>>, %arg9: memref<1x8x256xf32, #tpu.memory_space<vmem>>) attributes {dimension_semantics = [#tpu.dimension_semantics<parallel>], iteration_bounds = array<i64: 2>, scalar_prefetch = 0 : i64, scratch_operands = 0 : i64, tpu.core_type = #tpu.core_type<tc>, window_params = [{transform_indices = @transform_0, window_bounds = array<i64: 1, 8, 256>}, {pipeline_mode = #tpu.pipeline_mode<synchronous>, transform_indices = @transform_1, window_bounds = array<i64: 8, 8>}, {pipeline_mode = #tpu.pipeline_mode<synchronous>, transform_indices = @transform_2, window_bounds = array<i64: 8, 1>}, {pipeline_mode = #tpu.pipeline_mode<synchronous>, transform_indices = @transform_3, window_bounds = array<i64: 8, 72>}, {pipeline_mode = #tpu.pipeline_mode<synchronous>, transform_indices = @transform_4, window_bounds = array<i64: 8, 1>}, {pipeline_mode = #tpu.pipeline_mode<synchronous>, transform_indices = @transform_5, window_bounds = array<i64: 8, 72>}, {pipeline_mode = #tpu.pipeline_mode<synchronous>, transform_indices = @transform_6, window_bounds = array<i64: 8, 1>}, {pipeline_mode = #tpu.pipeline_mode<synchronous>, transform_indices = @transform_7, window_bounds = array<i64: 9, 1, 256>}, {transform_indices = @transform_8, window_bounds = array<i64: 1, 8, 256>}]} {
    %c0 = arith.constant 0 : index
    %c0_0 = arith.constant 0 : index
    %0 = vector.load %arg2[%c0, %c0_0] : memref<8x8xbf16, #tpu.memory_space<vmem>>, vector<8x8xbf16>
    %c0_1 = arith.constant 0 : index
    %c0_2 = arith.constant 0 : index
    %c0_3 = arith.constant 0 : index
    %1 = vector.load %arg1[%c0_1, %c0_2, %c0_3] : memref<1x8x256xf32, #tpu.memory_space<vmem>>, vector<1x8x256xf32>
    %2 = vector.shape_cast %1 : vector<1x8x256xf32> to vector<8x256xf32>
    %3 = arith.truncf %2 : vector<8x256xf32> to vector<8x256xbf16>
    %cst = arith.constant dense<0.000000e+00> : vector<8x256xf32>
    %4 = tpu.matmul %0, %3, %cst {dimension_numbers = #tpu.dot_dimension_numbers<[1], [0], [0], [1], [0, 0, 1, 1], [], []>} : vector<8x8xbf16>, vector<8x256xbf16>, vector<8x256xf32> -> vector<8x256xf32>
    %c0_4 = arith.constant 0 : index
    %c0_5 = arith.constant 0 : index
    %5 = vector.load %arg3[%c0_4, %c0_5] : memref<8x1xf32, #tpu.memory_space<vmem>>, vector<8x1xf32>
    %6 = vector.broadcast %5 : vector<8x1xf32> to vector<8x256xf32>
    %7 = arith.addf %4, %6 : vector<8x256xf32>
    %cst_6 = arith.constant 0.000000e+00 : f32
    %8 = vector.broadcast %cst_6 : f32 to vector<8x256xf32>
    %9 = arith.maximumf %7, %8 : vector<8x256xf32>
    %c17_i32 = arith.constant 17 : i32
    %10 = tpu.dynamic_rotate %9 by %c17_i32 dim 1 : vector<8x256xf32>, i32 -> vector<8x256xf32>
    %c0_7 = arith.constant 0 : index
    %c0_8 = arith.constant 0 : index
    %c0_9 = arith.constant 0 : index
    %11 = vector.load %arg8[%c0_7, %c0_8, %c0_9] : memref<9x1x256xf32, #tpu.memory_space<vmem>>, vector<1x1x256xf32>
    %12 = vector.shape_cast %11 : vector<1x1x256xf32> to vector<1x256xf32>
    %13 = vector.broadcast %12 : vector<1x256xf32> to vector<8x256xf32>
    %14 = arith.mulf %10, %13 : vector<8x256xf32>
    %c16_i32 = arith.constant 16 : i32
    %15 = tpu.dynamic_rotate %9 by %c16_i32 dim 1 : vector<8x256xf32>, i32 -> vector<8x256xf32>
    %c1 = arith.constant 1 : index
    %c0_10 = arith.constant 0 : index
    %c0_11 = arith.constant 0 : index
    %16 = vector.load %arg8[%c1, %c0_10, %c0_11] : memref<9x1x256xf32, #tpu.memory_space<vmem>>, vector<1x1x256xf32>
    %17 = vector.shape_cast %16 : vector<1x1x256xf32> to vector<1x256xf32>
    %18 = vector.broadcast %17 : vector<1x256xf32> to vector<8x256xf32>
    %19 = arith.mulf %15, %18 : vector<8x256xf32>
    %c15_i32 = arith.constant 15 : i32
    %20 = tpu.dynamic_rotate %9 by %c15_i32 dim 1 : vector<8x256xf32>, i32 -> vector<8x256xf32>
    %c2 = arith.constant 2 : index
    %c0_12 = arith.constant 0 : index
    %c0_13 = arith.constant 0 : index
    %21 = vector.load %arg8[%c2, %c0_12, %c0_13] : memref<9x1x256xf32, #tpu.memory_space<vmem>>, vector<1x1x256xf32>
    %22 = vector.shape_cast %21 : vector<1x1x256xf32> to vector<1x256xf32>
    %23 = vector.broadcast %22 : vector<1x256xf32> to vector<8x256xf32>
    %24 = arith.mulf %20, %23 : vector<8x256xf32>
    %c1_i32 = arith.constant 1 : i32
    %25 = tpu.dynamic_rotate %9 by %c1_i32 dim 1 : vector<8x256xf32>, i32 -> vector<8x256xf32>
    %c3 = arith.constant 3 : index
    %c0_14 = arith.constant 0 : index
    %c0_15 = arith.constant 0 : index
    %26 = vector.load %arg8[%c3, %c0_14, %c0_15] : memref<9x1x256xf32, #tpu.memory_space<vmem>>, vector<1x1x256xf32>
    %27 = vector.shape_cast %26 : vector<1x1x256xf32> to vector<1x256xf32>
    %28 = vector.broadcast %27 : vector<1x256xf32> to vector<8x256xf32>
    %29 = arith.mulf %25, %28 : vector<8x256xf32>
    %c4 = arith.constant 4 : index
    %c0_16 = arith.constant 0 : index
    %c0_17 = arith.constant 0 : index
    %30 = vector.load %arg8[%c4, %c0_16, %c0_17] : memref<9x1x256xf32, #tpu.memory_space<vmem>>, vector<1x1x256xf32>
    %31 = vector.shape_cast %30 : vector<1x1x256xf32> to vector<1x256xf32>
    %32 = vector.broadcast %31 : vector<1x256xf32> to vector<8x256xf32>
    %33 = arith.mulf %9, %32 : vector<8x256xf32>
    %c255_i32 = arith.constant 255 : i32
    %34 = tpu.dynamic_rotate %9 by %c255_i32 dim 1 : vector<8x256xf32>, i32 -> vector<8x256xf32>
    %c5 = arith.constant 5 : index
    %c0_18 = arith.constant 0 : index
    %c0_19 = arith.constant 0 : index
    %35 = vector.load %arg8[%c5, %c0_18, %c0_19] : memref<9x1x256xf32, #tpu.memory_space<vmem>>, vector<1x1x256xf32>
    %36 = vector.shape_cast %35 : vector<1x1x256xf32> to vector<1x256xf32>
    %37 = vector.broadcast %36 : vector<1x256xf32> to vector<8x256xf32>
    %38 = arith.mulf %34, %37 : vector<8x256xf32>
    %c241_i32 = arith.constant 241 : i32
    %39 = tpu.dynamic_rotate %9 by %c241_i32 dim 1 : vector<8x256xf32>, i32 -> vector<8x256xf32>
    %c6 = arith.constant 6 : index
    %c0_20 = arith.constant 0 : index
    %c0_21 = arith.constant 0 : index
    %40 = vector.load %arg8[%c6, %c0_20, %c0_21] : memref<9x1x256xf32, #tpu.memory_space<vmem>>, vector<1x1x256xf32>
    %41 = vector.shape_cast %40 : vector<1x1x256xf32> to vector<1x256xf32>
    %42 = vector.broadcast %41 : vector<1x256xf32> to vector<8x256xf32>
    %43 = arith.mulf %39, %42 : vector<8x256xf32>
    %c240_i32 = arith.constant 240 : i32
    %44 = tpu.dynamic_rotate %9 by %c240_i32 dim 1 : vector<8x256xf32>, i32 -> vector<8x256xf32>
    %c7 = arith.constant 7 : index
    %c0_22 = arith.constant 0 : index
    %c0_23 = arith.constant 0 : index
    %45 = vector.load %arg8[%c7, %c0_22, %c0_23] : memref<9x1x256xf32, #tpu.memory_space<vmem>>, vector<1x1x256xf32>
    %46 = vector.shape_cast %45 : vector<1x1x256xf32> to vector<1x256xf32>
    %47 = vector.broadcast %46 : vector<1x256xf32> to vector<8x256xf32>
    %48 = arith.mulf %44, %47 : vector<8x256xf32>
    %c239_i32 = arith.constant 239 : i32
    %49 = tpu.dynamic_rotate %9 by %c239_i32 dim 1 : vector<8x256xf32>, i32 -> vector<8x256xf32>
    %c8 = arith.constant 8 : index
    %c0_24 = arith.constant 0 : index
    %c0_25 = arith.constant 0 : index
    %50 = vector.load %arg8[%c8, %c0_24, %c0_25] : memref<9x1x256xf32, #tpu.memory_space<vmem>>, vector<1x1x256xf32>
    %51 = vector.shape_cast %50 : vector<1x1x256xf32> to vector<1x256xf32>
    %52 = vector.broadcast %51 : vector<1x256xf32> to vector<8x256xf32>
    %53 = arith.mulf %49, %52 : vector<8x256xf32>
    %54 = tpu.concatenate %14, %19, %24, %29, %33, %38, %43, %48, %53 in 0 : vector<8x256xf32>, vector<8x256xf32>, vector<8x256xf32>, vector<8x256xf32>, vector<8x256xf32>, vector<8x256xf32>, vector<8x256xf32>, vector<8x256xf32>, vector<8x256xf32> -> vector<72x256xf32>
    %55 = arith.truncf %54 : vector<72x256xf32> to vector<72x256xbf16>
    %c0_26 = arith.constant 0 : index
    %c0_27 = arith.constant 0 : index
    %56 = vector.load %arg4[%c0_26, %c0_27] : memref<8x72xbf16, #tpu.memory_space<vmem>>, vector<8x72xbf16>
    %cst_28 = arith.constant dense<0.000000e+00> : vector<8x256xf32>
    %57 = tpu.matmul %56, %55, %cst_28 {dimension_numbers = #tpu.dot_dimension_numbers<[1], [0], [0], [1], [0, 0, 1, 1], [], []>} : vector<8x72xbf16>, vector<72x256xbf16>, vector<8x256xf32> -> vector<8x256xf32>
    %c0_29 = arith.constant 0 : index
    %c0_30 = arith.constant 0 : index
    %58 = vector.load %arg5[%c0_29, %c0_30] : memref<8x1xf32, #tpu.memory_space<vmem>>, vector<8x1xf32>
    %59 = vector.broadcast %58 : vector<8x1xf32> to vector<8x256xf32>
    %60 = arith.addf %57, %59 : vector<8x256xf32>
    %cst_31 = arith.constant 0.000000e+00 : f32
    %61 = vector.broadcast %cst_31 : f32 to vector<8x256xf32>
    %62 = arith.maximumf %60, %61 : vector<8x256xf32>
    %c17_i32_32 = arith.constant 17 : i32
    %63 = tpu.dynamic_rotate %62 by %c17_i32_32 dim 1 : vector<8x256xf32>, i32 -> vector<8x256xf32>
    %c0_33 = arith.constant 0 : index
    %c0_34 = arith.constant 0 : index
    %c0_35 = arith.constant 0 : index
    %64 = vector.load %arg8[%c0_33, %c0_34, %c0_35] : memref<9x1x256xf32, #tpu.memory_space<vmem>>, vector<1x1x256xf32>
    %65 = vector.shape_cast %64 : vector<1x1x256xf32> to vector<1x256xf32>
    %66 = vector.broadcast %65 : vector<1x256xf32> to vector<8x256xf32>
    %67 = arith.mulf %63, %66 : vector<8x256xf32>
    %c16_i32_36 = arith.constant 16 : i32
    %68 = tpu.dynamic_rotate %62 by %c16_i32_36 dim 1 : vector<8x256xf32>, i32 -> vector<8x256xf32>
    %c1_37 = arith.constant 1 : index
    %c0_38 = arith.constant 0 : index
    %c0_39 = arith.constant 0 : index
    %69 = vector.load %arg8[%c1_37, %c0_38, %c0_39] : memref<9x1x256xf32, #tpu.memory_space<vmem>>, vector<1x1x256xf32>
    %70 = vector.shape_cast %69 : vector<1x1x256xf32> to vector<1x256xf32>
    %71 = vector.broadcast %70 : vector<1x256xf32> to vector<8x256xf32>
    %72 = arith.mulf %68, %71 : vector<8x256xf32>
    %c15_i32_40 = arith.constant 15 : i32
    %73 = tpu.dynamic_rotate %62 by %c15_i32_40 dim 1 : vector<8x256xf32>, i32 -> vector<8x256xf32>
    %c2_41 = arith.constant 2 : index
    %c0_42 = arith.constant 0 : index
    %c0_43 = arith.constant 0 : index
    %74 = vector.load %arg8[%c2_41, %c0_42, %c0_43] : memref<9x1x256xf32, #tpu.memory_space<vmem>>, vector<1x1x256xf32>
    %75 = vector.shape_cast %74 : vector<1x1x256xf32> to vector<1x256xf32>
    %76 = vector.broadcast %75 : vector<1x256xf32> to vector<8x256xf32>
    %77 = arith.mulf %73, %76 : vector<8x256xf32>
    %c1_i32_44 = arith.constant 1 : i32
    %78 = tpu.dynamic_rotate %62 by %c1_i32_44 dim 1 : vector<8x256xf32>, i32 -> vector<8x256xf32>
    %c3_45 = arith.constant 3 : index
    %c0_46 = arith.constant 0 : index
    %c0_47 = arith.constant 0 : index
    %79 = vector.load %arg8[%c3_45, %c0_46, %c0_47] : memref<9x1x256xf32, #tpu.memory_space<vmem>>, vector<1x1x256xf32>
    %80 = vector.shape_cast %79 : vector<1x1x256xf32> to vector<1x256xf32>
    %81 = vector.broadcast %80 : vector<1x256xf32> to vector<8x256xf32>
    %82 = arith.mulf %78, %81 : vector<8x256xf32>
    %c4_48 = arith.constant 4 : index
    %c0_49 = arith.constant 0 : index
    %c0_50 = arith.constant 0 : index
    %83 = vector.load %arg8[%c4_48, %c0_49, %c0_50] : memref<9x1x256xf32, #tpu.memory_space<vmem>>, vector<1x1x256xf32>
    %84 = vector.shape_cast %83 : vector<1x1x256xf32> to vector<1x256xf32>
    %85 = vector.broadcast %84 : vector<1x256xf32> to vector<8x256xf32>
    %86 = arith.mulf %62, %85 : vector<8x256xf32>
    %c255_i32_51 = arith.constant 255 : i32
    %87 = tpu.dynamic_rotate %62 by %c255_i32_51 dim 1 : vector<8x256xf32>, i32 -> vector<8x256xf32>
    %c5_52 = arith.constant 5 : index
    %c0_53 = arith.constant 0 : index
    %c0_54 = arith.constant 0 : index
    %88 = vector.load %arg8[%c5_52, %c0_53, %c0_54] : memref<9x1x256xf32, #tpu.memory_space<vmem>>, vector<1x1x256xf32>
    %89 = vector.shape_cast %88 : vector<1x1x256xf32> to vector<1x256xf32>
    %90 = vector.broadcast %89 : vector<1x256xf32> to vector<8x256xf32>
    %91 = arith.mulf %87, %90 : vector<8x256xf32>
    %c241_i32_55 = arith.constant 241 : i32
    %92 = tpu.dynamic_rotate %62 by %c241_i32_55 dim 1 : vector<8x256xf32>, i32 -> vector<8x256xf32>
    %c6_56 = arith.constant 6 : index
    %c0_57 = arith.constant 0 : index
    %c0_58 = arith.constant 0 : index
    %93 = vector.load %arg8[%c6_56, %c0_57, %c0_58] : memref<9x1x256xf32, #tpu.memory_space<vmem>>, vector<1x1x256xf32>
    %94 = vector.shape_cast %93 : vector<1x1x256xf32> to vector<1x256xf32>
    %95 = vector.broadcast %94 : vector<1x256xf32> to vector<8x256xf32>
    %96 = arith.mulf %92, %95 : vector<8x256xf32>
    %c240_i32_59 = arith.constant 240 : i32
    %97 = tpu.dynamic_rotate %62 by %c240_i32_59 dim 1 : vector<8x256xf32>, i32 -> vector<8x256xf32>
    %c7_60 = arith.constant 7 : index
    %c0_61 = arith.constant 0 : index
    %c0_62 = arith.constant 0 : index
    %98 = vector.load %arg8[%c7_60, %c0_61, %c0_62] : memref<9x1x256xf32, #tpu.memory_space<vmem>>, vector<1x1x256xf32>
    %99 = vector.shape_cast %98 : vector<1x1x256xf32> to vector<1x256xf32>
    %100 = vector.broadcast %99 : vector<1x256xf32> to vector<8x256xf32>
    %101 = arith.mulf %97, %100 : vector<8x256xf32>
    %c239_i32_63 = arith.constant 239 : i32
    %102 = tpu.dynamic_rotate %62 by %c239_i32_63 dim 1 : vector<8x256xf32>, i32 -> vector<8x256xf32>
    %c8_64 = arith.constant 8 : index
    %c0_65 = arith.constant 0 : index
    %c0_66 = arith.constant 0 : index
    %103 = vector.load %arg8[%c8_64, %c0_65, %c0_66] : memref<9x1x256xf32, #tpu.memory_space<vmem>>, vector<1x1x256xf32>
    %104 = vector.shape_cast %103 : vector<1x1x256xf32> to vector<1x256xf32>
    %105 = vector.broadcast %104 : vector<1x256xf32> to vector<8x256xf32>
    %106 = arith.mulf %102, %105 : vector<8x256xf32>
    %107 = tpu.concatenate %67, %72, %77, %82, %86, %91, %96, %101, %106 in 0 : vector<8x256xf32>, vector<8x256xf32>, vector<8x256xf32>, vector<8x256xf32>, vector<8x256xf32>, vector<8x256xf32>, vector<8x256xf32>, vector<8x256xf32>, vector<8x256xf32> -> vector<72x256xf32>
    %108 = arith.truncf %107 : vector<72x256xf32> to vector<72x256xbf16>
    %c0_67 = arith.constant 0 : index
    %c0_68 = arith.constant 0 : index
    %109 = vector.load %arg6[%c0_67, %c0_68] : memref<8x72xbf16, #tpu.memory_space<vmem>>, vector<8x72xbf16>
    %cst_69 = arith.constant dense<0.000000e+00> : vector<8x256xf32>
    %110 = tpu.matmul %109, %108, %cst_69 {dimension_numbers = #tpu.dot_dimension_numbers<[1], [0], [0], [1], [0, 0, 1, 1], [], []>} : vector<8x72xbf16>, vector<72x256xbf16>, vector<8x256xf32> -> vector<8x256xf32>
    %c0_70 = arith.constant 0 : index
    %c0_71 = arith.constant 0 : index
    %111 = vector.load %arg7[%c0_70, %c0_71] : memref<8x1xf32, #tpu.memory_space<vmem>>, vector<8x1xf32>
    %112 = vector.broadcast %111 : vector<8x1xf32> to vector<8x256xf32>
    %113 = arith.addf %110, %112 : vector<8x256xf32>
    %c0_72 = arith.constant 0 : index
    %c0_73 = arith.constant 0 : index
    %c0_74 = arith.constant 0 : index
    %114 = vector.load %arg1[%c0_72, %c0_73, %c0_74] : memref<1x8x256xf32, #tpu.memory_space<vmem>>, vector<1x8x256xf32>
    %115 = vector.shape_cast %114 : vector<1x8x256xf32> to vector<8x256xf32>
    %116 = arith.addf %113, %115 : vector<8x256xf32>
    %cst_75 = arith.constant 0.000000e+00 : f32
    %117 = vector.broadcast %cst_75 : f32 to vector<8x256xf32>
    %118 = arith.maximumf %116, %117 : vector<8x256xf32>
    %c0_76 = arith.constant 0 : index
    %c0_77 = arith.constant 0 : index
    %c0_78 = arith.constant 0 : index
    %119 = vector.load %arg9[%c0_76, %c0_77, %c0_78] : memref<1x8x256xf32, #tpu.memory_space<vmem>>, vector<1x8x256xf32>
    %120 = vector.shape_cast %119 : vector<1x8x256xf32> to vector<8x256xf32>
    %121 = vector.shape_cast %118 : vector<8x256xf32> to vector<1x8x256xf32>
    tpu.vector_store %arg9[%c0_76, %c0_77, %c0_78], %121 {strides = array<i32>} : memref<1x8x256xf32, #tpu.memory_space<vmem>>, vector<1x8x256xf32>,
    return
  }
  func.func @transform_0(%arg0: i32) -> (i32, i32, i32) {
    %c0_i32 = arith.constant 0 : i32
    %c0_i32_0 = arith.constant 0 : i32
    %c0_i32_1 = arith.constant 0 : i32
    return %arg0, %c0_i32, %c0_i32_0 : i32, i32, i32
  }
  func.func @transform_1(%arg0: i32) -> (i32, i32) {
    %c0_i32 = arith.constant 0 : i32
    %c0_i32_0 = arith.constant 0 : i32
    %c0_i32_1 = arith.constant 0 : i32
    return %c0_i32, %c0_i32_0 : i32, i32
  }
  func.func @transform_2(%arg0: i32) -> (i32, i32) {
    %c0_i32 = arith.constant 0 : i32
    %c0_i32_0 = arith.constant 0 : i32
    %c0_i32_1 = arith.constant 0 : i32
    return %c0_i32, %c0_i32_0 : i32, i32
  }
  func.func @transform_3(%arg0: i32) -> (i32, i32) {
    %c0_i32 = arith.constant 0 : i32
    %c0_i32_0 = arith.constant 0 : i32
    %c0_i32_1 = arith.constant 0 : i32
    return %c0_i32, %c0_i32_0 : i32, i32
  }
  func.func @transform_4(%arg0: i32) -> (i32, i32) {
    %c0_i32 = arith.constant 0 : i32
    %c0_i32_0 = arith.constant 0 : i32
    %c0_i32_1 = arith.constant 0 : i32
    return %c0_i32, %c0_i32_0 : i32, i32
  }
  func.func @transform_5(%arg0: i32) -> (i32, i32) {
    %c0_i32 = arith.constant 0 : i32
    %c0_i32_0 = arith.constant 0 : i32
    %c0_i32_1 = arith.constant 0 : i32
    return %c0_i32, %c0_i32_0 : i32, i32
  }
  func.func @transform_6(%arg0: i32) -> (i32, i32) {
    %c0_i32 = arith.constant 0 : i32
    %c0_i32_0 = arith.constant 0 : i32
    %c0_i32_1 = arith.constant 0 : i32
    return %c0_i32, %c0_i32_0 : i32, i32
  }
  func.func @transform_7(%arg0: i32) -> (i32, i32, i32) {
    %c0_i32 = arith.constant 0 : i32
    %c0_i32_0 = arith.constant 0 : i32
    %c0_i32_1 = arith.constant 0 : i32
    %c0_i32_2 = arith.constant 0 : i32
    return %c0_i32, %c0_i32_0, %c0_i32_1 : i32, i32, i32
  }
  func.func @transform_8(%arg0: i32) -> (i32, i32, i32) {
    %c0_i32 = arith.constant 0 : i32
    %c0_i32_0 = arith.constant 0 : i32
    %c0_i32_1 = arith.constant 0 : i32
    return %arg0, %c0_i32, %c0_i32_0 : i32, i32, i32
  }
}

</mosaic_0001>

<bundles_post_ra>
// kernel: tpu_custom_call.1
= control target key start
LH: loop header
LB: loop body
LE: loop exit
PB: predicated region body
PF: predicated region fallthrough
CT: control target
= control target key end

     0   :  { %s1504_s0 = inlined_call_operand.hbm [shape: f32[2,8,256], index: 0, kind: input, shape index: {}]   ;;  %s1505_s1 = inlined_call_operand.vmem [shape: bf16[8,8], index: 1, kind: input, shape index: {}]   ;;  %s1506_s2 = inlined_call_operand.vmem [shape: f32[8,1], index: 2, kind: input, shape index: {}]   ;;  %s1507_s3 = inlined_call_operand.vmem [shape: bf16[8,72], index: 3, kind: input, shape index: {}]   ;;  %s1508_s4 = inlined_call_operand.vmem [shape: f32[8,1], index: 4, kind: input, shape index: {}]   ;;  %s1509_s5 = inlined_call_operand.vmem [shape: bf16[8,72], index: 5, kind: input, shape index: {}]   ;;  %s1510_s6 = inlined_call_operand.vmem [shape: f32[8,1], index: 6, kind: input, shape index: {}]   ;;  %s1511_s7 = inlined_call_operand.hbm [shape: f32[9,1,256], index: 7, kind: input, shape index: {}]   ;;  %s1512_s8 = inlined_call_operand.hbm [shape: f32[2,8,256], index: 8, kind: output, shape index: {}]  }
   0x1   :  { %1513 = sst [smem:[#allocation12_spill]] %s1511_s7 }
   0x2   :  { %13 = vsyncpa [#allocation3], 0 }
   0x3   :  { %15 = vsyncpa [#allocation3 + $0x1], 0 }
   0x4   :  { %16 = vsyncpa [#allocation6], 0 }
   0x5   :  { %17 = vsyncpa [#allocation4], 0 }
   0x6   :  { %19 = vsyncpa [#allocation4 + $0x1], 0  ;;  %s1090_s27 = smov 0   ;;  %s1092_s28 = smov 0  }
   0x7   :  { %s1094_s29 = smov 0   ;;  %s1096_s30 = smov 0  }
   0x8 LB: > { %s1514_s7 = sld [smem:[#allocation12_spill]]  ;;  %s1114_s12 = sadd.s32 4294967295, %s1031_s30   ;;  %s1031_s30 = sphi %s1096_s30, %s1526_s30   ;;  %s1027_s29 = sphi %s1094_s29, %s1525_s29   ;;  %s1023_s28 = sphi %s1092_s28, %s1524_s28   ;;  %s1019_s27 = sphi %s1090_s27, %s1523_s27  }
   0x9   : > { %p807_p0 = scmp.ge.s32.totalorder %s1031_s30, 1  ;;  %p46_p1 = scmp.eq.s32.totalorder %s1114_s12, 0 }
   0xa   : > { %p229_p2 = scmp.lt.s32.totalorder %s1031_s30, 3  ;;  %s1033_s14 = smov [#allocation5]  }
   0xb   : > { %s260_s15 = sshll.u32 %s1033_s14, 4  ;;  %s1034_s16 = smov 32   ;;  %s261_s15 = int_to_ptr.vmem [resolvable:$true] %s260_s15 }
   0xc   : > { %p1119_p3 = pnand %p807_p0, %p229_p2  ;;  %s1035_s17 = smov 2  }
   0xd   : > { %s806_s18 = sadd.s32 4294967294, %s1031_s30   ;;  %s1130_s19 = sadd.s32 1, %s1031_s30  }
   0xe   : > { %s258_s11 = sshll.u32 %s1514_s7, 4  ;;  %p838_p4 = pneg %p1119_p3  ;;  %s259_s11 = int_to_ptr.hbm [resolvable:$true] %s258_s11 }
   0xf   : > { %s32_s20 = sadd.s32 1, %s1027_s29  ;;  %s29_s21 = ssub.s32 %s1031_s30, %s1130_s19 }
  0x10   : > { %p839_p6 = pnand %p838_p4, %p46_p1  ;;  %p39_p7 = scmp.ne.s32.totalorder %s1027_s29, %s1023_s28 }
  0x11   : > { %p30_p8 = scmp.eq.s32.totalorder %s29_s21, 0  ;;  %p40_p9 = scmp.eq.s32.totalorder %s1031_s30, 0 }
  0x12   : > { %841 = dma.hbm_to_vmem [thread:$0]  (!%p839_p6), %s259_s11, 288, %s261_s15, [#allocation6], %s1034_s16, %s1034_s16, %s1035_s17  }
  0x13   : > { %p45_p10 = scmp.ne.s32.totalorder %s1023_s28, %s1019_s27  ;;  %p216_p11 = scmp.eq.s32.totalorder %s1114_s12, 1 }
  0x14   : > { %s1142_s22 = scalar_select %p30_p8, %s1027_s29, %s32_s20  }
  0x15   : > { %p1146_p12 = por %p46_p1, %p45_p10  ;;  %p1150_p13 = por %p216_p11, %p39_p7 }
  0x16   : > { %1516 = sst [smem:[#allocation11_spill]] %s1142_s22  ;;  %p222_p0 = scmp.eq.s32.totalorder %s806_s18, 1 }
  0x17   : > { %p41_p2 = por %p40_p9, %p39_p7  ;;  %s274_s25 = sand.u32 1, %s1027_s29  }
  0x18   : > { %p1155_p4 = por %p222_p0, %p45_p10  ;;  %p851_p6 = scmp.lt.s32.totalorder %s1031_s30, 2 }
  0x19   : > { %s810_s9 = sshll.u32 %s274_s25, 4  ;;  %s828_s10 = sshll.u32 %s1031_s30, 4 }
  0x1a   : > { %s283_s15 = scalar_lea.hbm %s1504_s0, %s828_s10  ;;  %s278_s17 = scalar_lea.vmem [#allocation2], %s810_s9 }
  0x1b   : > { %s285_s16 = sshll.u32 %s283_s15, 4  ;;  %s287_s20 = sshll.u32 %s278_s17, 4  ;;  %s286_s16 = int_to_ptr.hbm [resolvable:$true] %s285_s16  ;;  %s288_s20 = int_to_ptr.vmem [resolvable:$true] %s287_s20 }
  0x1c   : > { %p1164_p8 = pnand %p851_p6, %p41_p2  ;;  %s275_s21 = scalar_lea.sflag [#allocation3], %s274_s25 }
  0x1d   : > { %s931_s7 = sshra.s32 %s286_s16, 4  ;;  %s938_s9 = scalar_lea.hbm %s1504_s0, 32  ;;  %s932_s7 = int_to_ptr.hbm [resolvable:$true] %s931_s7 }
  0x1e   : > { %s933_s22 = scalar_lea.hbm %s932_s7, 16  ;;  %p935_p9 = pneg %p1164_p8 }
  0x1f   : > { %p934_p7 = scmp.ne.s32.totalorder %s932_s7, %s933_s22  ;;  %p939_p0 = scmp.lt.s32.totalorder %s932_s7, %s1504_s0 }
  0x20   : > { %p940_p2 = scmp.lt.s32.totalorder %s938_s9, %s933_s22 }
  0x21   : > { %p936_p10 = pnand %p935_p9, %p934_p7 }
  0x22   : > { %p941_p6 = por %p940_p2, %p939_p0 }
  0x23   : > { %p937_p11 = pneg %p936_p10 }
  0x25   : > { %p942_p5 = pnand %p941_p6, %p937_p11 }
  0x27   : > { %945 = shalt.err (!%p942_p5)
}
  0x28   : > { %845 = dma.hbm_to_vmem [thread:$0]  (!%p1164_p8), %s286_s16, 256, %s288_s20, %s275_s21  }
  0x29   : > { %296 = sbr.rel (%p1119_p3) target bundleno = 785 (0x311), region = 52  ;;  %s1181_s25 = sand.u32 (!%p1119_p3), 1, %s1023_s28  }
  0x2a   : > { %s814_s17 = sshll.u32 (!%p1119_p3), %s1181_s25, 4  ;;  %s299_s10 = scalar_lea.sflag (!%p1119_p3), [#allocation3], %s1181_s25 }
  0x2b   : > { %s302_s7 = scalar_lea.vmem (!%p1119_p3), [#allocation2], %s814_s17 }
  0x2e   : > { %1006 = dma.done.wait (%p1146_p12), %s299_s10, 256  }
  0x2f   : > { %1008 = vsyncadd (%p1146_p12), %s299_s10, 4294967040 }
  0x30   : > { %1010 = dma.done.wait (%p46_p1), [#allocation6], 288  }
  0x31   : > { %1012 = vsyncadd (%p46_p1), [#allocation6], 4294967008  ;;  %v1036_v0 = vmov 0   ;;  %v1195_v1 = vld [vmem:[%s302_s7] sm:$0xff]  ;;  %vm357_vm0 = vcmask 1043456   ;;  %v1197_v2 = vld [vmem:[%s302_s7 + $0x8] sm:$0xff]  ;;  %v396_v18 = vlaneseq }
  0x32   : > { %898 = vset.pattern.permute.xlu0 %v1036_v0  ;;  %899 = vset.pattern.permute.xlu2 %v1036_v0  ;;  %v345_v3 = vpack.c.bf16 %v1195_v1, %v1195_v1  ;;  %v346_v4 = vpack.c.bf16 %v1197_v2, %v1197_v2  ;;  %v347_v5 = vld [vmem:[%s1506_s2] sm:$0xff]  ;;  %vm353_vm1 = vcmask 64512   ;;  %s1037_s20 = smov 113   ;;  %s1038_s18 = smov 111   ;;  %v1249_v21 = vld [vmem:[#allocation5 + $0x10] sm:$0x3] }
  0x33   : > { %900 = vset.pattern.permute.xlu1 %v1036_v0  ;;  %350 = vperm.xlu0 %898, %v347_v5   ;;  %v342_v8 = vld [vmem:[%s1505_s1] sm:$0xf]  ;;  %s1039_s21 = smov 112   ;;  %s1040_s11 = smov 127   ;;  %v1247_v20 = vand.u32 127, %v396_v18  ;;  %v524_v22 = vperm.slane %v1249_v21, 0 }
  0x34   : > { %v359_v6 = vsel %vm357_vm0, %v345_v3, 0  ;;  %v362_v7 = vsel %vm357_vm0, %v346_v4, 0  ;;  %s1041_s9 = smov 15   ;;  %s1042_s14 = smov 1   ;;  %v525_v23 = vperm.slane %v1249_v21, 1  ;;  %v541_v0 = vld [vmem:[%s1508_s4] sm:$0xff] }
  0x35   : > { %371 = vmatpush.bf16.msra.mxu0 %v359_v6  ;;  %384 = vmatpush.bf16.msra.mxu1 %v362_v7  ;;  %s1043_s15 = smov 17   ;;  %s1044_s10 = smov 16   ;;  %vm518_vm2 = vcmp.lt.s32.totalorder %v1247_v20, 111  ;;  %v1262_v30 = vld [vmem:[#allocation5 + $0xc] sm:$0x3]  ;;  %vm486_vm3 = vcmp.lt.s32.totalorder %v1247_v20, 113 }
  0x36   : > { %v1264_v31 = vld [vmem:[#allocation5 + $0xe] sm:$0x3]  ;;  %v492_v35 = vperm.slane %v1262_v30, 0  ;;  %v493_v36 = vperm.slane %v1262_v30, 1  ;;  %vm502_vm4 = vcmp.lt.s32.totalorder %v1247_v20, 112  ;;  %vm470_vm5 = vcmp.lt.s32.totalorder %v1247_v20, 127 }
  0x37   : > { %v508_v39 = vperm.slane %v1264_v31, 0  ;;  %v509_v40 = vperm.slane %v1264_v31, 1  ;;  %v1286_v49 = vld [vmem:[#allocation5 + $0x8] sm:$0x3]  ;;  %v1292_v52 = vld [vmem:[#allocation5 + $0xa] sm:$0x3] }
  0x38   : > { %817 = vmatmul.msk.bf16.vlgmr.msra.gmra.mxu0 %vm353_vm1, %v342_v8  ;;  %818 = vmatmul.msk.bf16.vlgmr.msra.gmra.mxu1 %vm353_vm1, %v342_v8  ;;  %v460_v55 = vperm.slane %v1286_v49, 0  ;;  %v476_v56 = vperm.slane %v1292_v52, 0  ;;  %v477_v57 = vperm.slane %v1292_v52, 1  ;;  %v461_v58 = vperm.slane %v1286_v49, 1  ;;  %v1316_v7 = vld [vmem:[#allocation5 + $0x4] sm:$0x3] }
  0x39   : > { %vm429_vm6 = vcmp.lt.s32.totalorder %v1247_v20, 15  ;;  %vm445_vm7 = vcmp.lt.s32.totalorder %v1247_v20, 1  ;;  %vm398_vm8 = vcmp.lt.s32.totalorder %v1247_v20, 17  ;;  %vm413_vm9 = vcmp.lt.s32.totalorder %v1247_v20, 16  ;;  %v661_v20 = vld [vmem:[%s1509_s5] sm:$0xf] }
  0x3a   : > { %vm547_vm10 = vcmask 588800  }
  0xa5   : > { %v351_v9 = vpop.permute.xlu0 %350 }
  0xb5   : > { %v373_v10 = vpop.f32.mrf.mxu0  ;;  %v386_v11 = vpop.f32.mrf.mxu1 }
  0xb6   : > { %v374_v12 = vadd.f32 %v373_v10, %v351_v9  ;;  %v387_v13 = vadd.f32 %v386_v11, %v351_v9  ;;  %v1318_v10 = vld [vmem:[#allocation5 + $0x6] sm:$0x3]  ;;  %v435_v11 = vperm.slane %v1316_v7, 0 }
  0xb8   : > { %v1211_v14 = vmax.f32 %v374_v12, 0.0  ;;  %v1213_v15 = vmax.f32 %v387_v13, 0.0  ;;  %v436_v12 = vperm.slane %v1316_v7, 1  ;;  %v451_v13 = vperm.slane %v1318_v10, 0 }
  0xba   : > { %484 = vrot.lane.b32.xlu2 %v1213_v15, %s1037_s20  ;;  %516 = vrot.lane.b32.xlu1 %v1213_v15, %s1038_s18  ;;  %v464_v5 = vmul.f32 %v460_v55, %v1211_v14  ;;  %v465_v6 = vmul.f32 %v461_v58, %v1213_v15 }
  0xbb   : > { %514 = vrot.lane.b32.xlu0 %v1211_v14, %s1038_s18 }
  0xbd   : > { %v375_v16 = vpop.f32.mrf.mxu0  ;;  %v388_v17 = vpop.f32.mrf.mxu1 }
  0xc2   : > { %498 = vrot.lane.b32.xlu2 %v1211_v14, %s1039_s21  ;;  %482 = vrot.lane.b32.xlu1 %v1211_v14, %s1037_s20 }
  0xc3   : > { %500 = vrot.lane.b32.xlu0 %v1213_v15, %s1039_s21 }
  0xca   : > { %468 = vrot.lane.b32.xlu2 %v1213_v15, %s1040_s11  ;;  %466 = vrot.lane.b32.xlu1 %v1211_v14, %s1040_s11 }
  0xcb   : > { %425 = vrot.lane.b32.xlu0 %v1211_v14, %s1041_s9 }
  0xd2   : > { %441 = vrot.lane.b32.xlu2 %v1211_v14, %s1042_s14  ;;  %427 = vrot.lane.b32.xlu1 %v1213_v15, %s1041_s9 }
  0xd3   : > { %443 = vrot.lane.b32.xlu0 %v1213_v15, %s1042_s14 }
  0xda   : > { %394 = vrot.lane.b32.xlu2 %v1213_v15, %s1043_s15  ;;  %392 = vrot.lane.b32.xlu1 %v1211_v14, %s1043_s15 }
  0xdb   : > { %409 = vrot.lane.b32.xlu0 %v1211_v14, %s1044_s10  ;;  %v452_v14 = vperm.slane %v1318_v10, 1 }
  0xe2   : > { %411 = vrot.lane.b32.xlu1 %v1213_v15, %s1044_s10  ;;  %544 = vperm.xlu2 %899, %v541_v0   ;;  %v540_v0 = vld [vmem:[%s1507_s3] sm:$0xf] }
 0x114   : > { %v485_v19 = vpop.permute.xlu2 %484 }
 0x11c   : > { %v499_v32 = vpop.permute.xlu2 %498 }
 0x124   : > { %v469_v59 = vpop.permute.xlu2 %468 }
 0x12c   : > { %v517_v24 = vpop.permute.xlu1 %516  ;;  %v442_v16 = vpop.permute.xlu2 %441 }
 0x12d   : > { %v515_v25 = vpop.permute.xlu0 %514 }
 0x12e   : > { %v519_v26 = vsel %vm518_vm2, %v515_v25, %v517_v24  ;;  %v520_v27 = vsel %vm518_vm2, %v517_v24, %v515_v25 }
 0x12f   : > { %v528_v28 = vmul.f32 %v524_v22, %v519_v26  ;;  %v529_v29 = vmul.f32 %v525_v23, %v520_v27 }
 0x131   : > { %v538_v33 = vpack.c.bf16 %v528_v28, %v528_v28  ;;  %v539_v34 = vpack.c.bf16 %v529_v29, %v529_v29 }
 0x133   : > { %v552_v37 = vsel %vm357_vm0, %v538_v33, 0  ;;  %v555_v38 = vsel %vm357_vm0, %v539_v34, 0 }
 0x134   : > { %560 = vmatpush.bf16.msra.mxu2 %v552_v37  ;;  %573 = vmatpush.bf16.msra.mxu3 %v555_v38  ;;  %v483_v41 = vpop.permute.xlu1 %482  ;;  %v1342_v37 = vld [vmem:[#allocation5] sm:$0x3]  ;;  %v1344_v38 = vld [vmem:[#allocation5 + $0x2] sm:$0x3] }
 0x135   : > { %v487_v42 = vsel %vm486_vm3, %v483_v41, %v485_v19  ;;  %v488_v43 = vsel %vm486_vm3, %v485_v19, %v483_v41  ;;  %v501_v44 = vpop.permute.xlu0 %500  ;;  %v403_v41 = vperm.slane %v1342_v37, 0 }
 0x136   : > { %v496_v45 = vmul.f32 %v492_v35, %v487_v42  ;;  %v497_v46 = vmul.f32 %v493_v36, %v488_v43  ;;  %v503_v47 = vsel %vm502_vm4, %v499_v32, %v501_v44  ;;  %v504_v48 = vsel %vm502_vm4, %v501_v44, %v499_v32  ;;  %v395_v42 = vpop.permute.xlu2 %394 }
 0x137   : > { %v512_v50 = vmul.f32 %v508_v39, %v503_v47  ;;  %v513_v51 = vmul.f32 %v509_v40, %v504_v48  ;;  %v404_v43 = vperm.slane %v1342_v37, 1  ;;  %v419_v44 = vperm.slane %v1344_v38, 0 }
 0x139   : > { %v536_v53 = vpack.c.bf16 %v512_v50, %v496_v45  ;;  %v537_v54 = vpack.c.bf16 %v513_v51, %v497_v46  ;;  %v420_v45 = vperm.slane %v1344_v38, 1 }
 0x13b   : > { %561 = vmatpush.bf16.msra.mxu2 %v536_v53  ;;  %574 = vmatpush.bf16.msra.mxu3 %v537_v54 }
 0x13c   : > { %v467_v60 = vpop.permute.xlu1 %466 }
 0x13d   : > { %v471_v61 = vsel %vm470_vm5, %v467_v60, %v469_v59  ;;  %v472_v62 = vsel %vm470_vm5, %v469_v59, %v467_v60  ;;  %v426_v63 = vpop.permute.xlu0 %425 }
 0x13e   : > { %v480_v3 = vmul.f32 %v476_v56, %v471_v61  ;;  %v481_v4 = vmul.f32 %v477_v57, %v472_v62 }
 0x140   : > { %v534_v8 = vpack.c.bf16 %v480_v3, %v464_v5  ;;  %v535_v9 = vpack.c.bf16 %v481_v4, %v465_v6  ;;  %v545_v3 = vpop.permute.xlu2 %544 }
 0x142   : > { %562 = vmatpush.bf16.msra.mxu2 %v534_v8  ;;  %575 = vmatpush.bf16.msra.mxu3 %v535_v9 }
 0x144   : > { %v428_v15 = vpop.permute.xlu1 %427 }
 0x145   : > { %v430_v17 = vsel %vm429_vm6, %v426_v63, %v428_v15  ;;  %v431_v18 = vsel %vm429_vm6, %v428_v15, %v426_v63  ;;  %v444_v19 = vpop.permute.xlu0 %443 }
 0x146   : > { %v439_v24 = vmul.f32 %v435_v11, %v431_v18  ;;  %v440_v25 = vmul.f32 %v436_v12, %v430_v17  ;;  %v446_v26 = vsel %vm445_vm7, %v442_v16, %v444_v19  ;;  %v447_v27 = vsel %vm445_vm7, %v444_v19, %v442_v16 }
 0x147   : > { %v455_v28 = vmul.f32 %v451_v13, %v447_v27  ;;  %v456_v29 = vmul.f32 %v452_v14, %v446_v26 }
 0x149   : > { %v532_v32 = vpack.c.bf16 %v455_v28, %v439_v24  ;;  %v533_v33 = vpack.c.bf16 %v456_v29, %v440_v25 }
 0x14b   : > { %563 = vmatpush.bf16.msra.mxu2 %v532_v32  ;;  %576 = vmatpush.bf16.msra.mxu3 %v533_v33 }
 0x14c   : > { %v393_v34 = vpop.permute.xlu1 %392 }
 0x14d   : > { %v399_v46 = vsel %vm398_vm8, %v393_v34, %v395_v42  ;;  %v400_v47 = vsel %vm398_vm8, %v395_v42, %v393_v34  ;;  %v410_v48 = vpop.permute.xlu0 %409 }
 0x14e   : > { %v407_v54 = vmul.f32 %v403_v41, %v400_v47  ;;  %v408_v59 = vmul.f32 %v404_v43, %v399_v46 }
 0x154   : > { %v412_v50 = vpop.permute.xlu1 %411 }
 0x155   : > { %v414_v51 = vsel %vm413_vm9, %v410_v48, %v412_v50  ;;  %v415_v53 = vsel %vm413_vm9, %v412_v50, %v410_v48 }
 0x156   : > { %v423_v60 = vmul.f32 %v419_v44, %v415_v53  ;;  %v424_v61 = vmul.f32 %v420_v45, %v414_v51 }
 0x158   : > { %v530_v62 = vpack.c.bf16 %v423_v60, %v407_v54  ;;  %v531_v63 = vpack.c.bf16 %v424_v61, %v408_v59 }
 0x15a   : > { %564 = vmatpush.bf16.msra.mxu2 %v530_v62  ;;  %577 = vmatpush.bf16.msra.mxu3 %v531_v63 }
 0x15d   : > { %819 = vmatmul.msk.bf16.vlgmr.msra.gmra.mxu2 %vm547_vm10, %v540_v0  ;;  %820 = vmatmul.msk.bf16.vlgmr.msra.gmra.mxu3 %vm547_vm10, %v540_v0 }
 0x1e0   : > { %v566_v4 = vpop.f32.mrf.mxu2  ;;  %v579_v5 = vpop.f32.mrf.mxu3 }
 0x1e1   : > { %v567_v6 = vadd.f32 %v566_v4, %v545_v3  ;;  %v580_v8 = vadd.f32 %v579_v5, %v545_v3 }
 0x1e3   : > { %v583_v9 = vmax.f32 %v567_v6, 0.0  ;;  %v584_v15 = vmax.f32 %v580_v8, 0.0 }
 0x1e5   : > { %645 = vrot.lane.b32.xlu1 %v584_v15, %s1038_s18  ;;  %627 = vrot.lane.b32.xlu2 %v583_v9, %s1037_s20  ;;  %v617_v63 = vmul.f32 %v583_v9, %v460_v55  ;;  %v618_v0 = vmul.f32 %v584_v15, %v461_v58 }
 0x1e6   : > { %643 = vrot.lane.b32.xlu0 %v583_v9, %s1038_s18 }
 0x1e8   : > { %v568_v16 = vpop.f32.mrf.mxu2  ;;  %v581_v17 = vpop.f32.mrf.mxu3 }
 0x1ed   : > { %635 = vrot.lane.b32.xlu1 %v583_v9, %s1039_s21  ;;  %637 = vrot.lane.b32.xlu2 %v584_v15, %s1039_s21 }
 0x1ee   : > { %629 = vrot.lane.b32.xlu0 %v584_v15, %s1037_s20  ;;  %s981_s20 = scalar_lea.hbm %s1512_s8, 32 }
 0x1f5   : > { %621 = vrot.lane.b32.xlu1 %v584_v15, %s1040_s11  ;;  %601 = vrot.lane.b32.xlu2 %v583_v9, %s1041_s9 }
 0x1f6   : > { %619 = vrot.lane.b32.xlu0 %v583_v9, %s1040_s11  ;;  %s829_s11 = sshll.u32 %s1114_s12, 4  ;;  %s710_s12 = scalar_lea.sflag [#allocation4], %s1181_s25 }
 0x1fd   : > { %609 = vrot.lane.b32.xlu1 %v583_v9, %s1042_s14  ;;  %611 = vrot.lane.b32.xlu2 %v584_v15, %s1042_s14 }
 0x1fe   : > { %603 = vrot.lane.b32.xlu0 %v584_v15, %s1041_s9 }
 0x205   : > { %587 = vrot.lane.b32.xlu1 %v584_v15, %s1043_s15  ;;  %593 = vrot.lane.b32.xlu2 %v583_v9, %s1044_s10 }
 0x206   : > { %585 = vrot.lane.b32.xlu0 %v583_v9, %s1043_s15  ;;  %s721_s15 = scalar_lea.hbm %s1512_s8, %s829_s11 }
 0x207   : > { %s725_s13 = sshll.u32 %s721_s15, 4  ;;  %s726_s13 = int_to_ptr.hbm [resolvable:$true] %s725_s13 }
 0x208   : > { %s975_s22 = sshra.s32 %s726_s13, 4  ;;  %s976_s22 = int_to_ptr.hbm [resolvable:$true] %s975_s22 }
 0x209   : > { %s977_s23 = scalar_lea.hbm %s976_s22, 16  ;;  %p982_p12 = scmp.lt.s32.totalorder %s976_s22, %s1512_s8 }
 0x20a   : > { %p978_p1 = scmp.ne.s32.totalorder %s976_s22, %s977_s23  ;;  %p983_p8 = scmp.lt.s32.totalorder %s981_s20, %s977_s23 }
 0x20c   : > { %p979_p3 = pnand %p978_p1, %p1150_p13  ;;  %p984_p7 = por %p983_p8, %p982_p12 }
 0x20e   : > { %595 = vrot.lane.b32.xlu0 %v584_v15, %s1044_s10  ;;  %s340_s10 = scalar_lea.vmem [#allocation7], %s814_s17  ;;  %p980_p5 = pneg %p979_p3 }
 0x20f   : > { %s723_s7 = sshll.u32 %s340_s10, 4  ;;  %s724_s7 = int_to_ptr.vmem [resolvable:$true] %s723_s7 }
 0x210   : > { %p985_p9 = pnand %p984_p7, %p980_p5 }
 0x23f   : > { %v628_v18 = vpop.permute.xlu2 %627 }
 0x247   : > { %v638_v29 = vpop.permute.xlu2 %637 }
 0x24f   : > { %v602_v61 = vpop.permute.xlu2 %601 }
 0x257   : > { %v646_v19 = vpop.permute.xlu1 %645  ;;  %v612_v5 = vpop.permute.xlu2 %611 }
 0x258   : > { %v644_v24 = vpop.permute.xlu0 %643 }
 0x259   : > { %v647_v25 = vsel %vm518_vm2, %v644_v24, %v646_v19  ;;  %v648_v26 = vsel %vm518_vm2, %v646_v19, %v644_v24 }
 0x25a   : > { %v649_v27 = vmul.f32 %v647_v25, %v524_v22  ;;  %v650_v28 = vmul.f32 %v648_v26, %v525_v23 }
 0x25c   : > { %v659_v32 = vpack.c.bf16 %v649_v27, %v649_v27  ;;  %v660_v33 = vpack.c.bf16 %v650_v28, %v650_v28 }
 0x25e   : > { %v672_v34 = vsel %vm357_vm0, %v659_v32, 0  ;;  %v675_v42 = vsel %vm357_vm0, %v660_v33, 0 }
 0x25f   : > { %680 = vmatpush.bf16.msrb.mxu0 %v672_v34  ;;  %693 = vmatpush.bf16.msrb.mxu1 %v675_v42  ;;  %v636_v46 = vpop.permute.xlu1 %635  ;;  %v594_v19 = vpop.permute.xlu2 %593 }
 0x260   : > { %v639_v47 = vsel %vm502_vm4, %v636_v46, %v638_v29  ;;  %v640_v48 = vsel %vm502_vm4, %v638_v29, %v636_v46  ;;  %v630_v22 = vpop.permute.xlu0 %629 }
 0x261   : > { %v641_v21 = vmul.f32 %v639_v47, %v508_v39  ;;  %v642_v23 = vmul.f32 %v640_v48, %v509_v40  ;;  %v631_v50 = vsel %vm486_vm3, %v628_v18, %v630_v22  ;;  %v632_v51 = vsel %vm486_vm3, %v630_v22, %v628_v18 }
 0x262   : > { %v633_v53 = vmul.f32 %v631_v50, %v492_v35  ;;  %v634_v54 = vmul.f32 %v632_v51, %v493_v36  ;;  %v662_v35 = vld [vmem:[%s1510_s6] sm:$0xff] }
 0x263   : > { %665 = vperm.xlu1 %900, %v662_v35  }
 0x264   : > { %v657_v59 = vpack.c.bf16 %v641_v21, %v633_v53  ;;  %v658_v60 = vpack.c.bf16 %v642_v23, %v634_v54 }
 0x266   : > { %681 = vmatpush.bf16.msrb.mxu0 %v657_v59  ;;  %694 = vmatpush.bf16.msrb.mxu1 %v658_v60 }
 0x267   : > { %v622_v39 = vpop.permute.xlu1 %621 }
 0x268   : > { %v620_v31 = vpop.permute.xlu0 %619 }
 0x269   : > { %v623_v40 = vsel %vm470_vm5, %v620_v31, %v622_v39  ;;  %v624_v62 = vsel %vm470_vm5, %v622_v39, %v620_v31 }
 0x26a   : > { %v625_v30 = vmul.f32 %v623_v40, %v476_v56  ;;  %v626_v36 = vmul.f32 %v624_v62, %v477_v57 }
 0x26c   : > { %v655_v3 = vpack.c.bf16 %v625_v30, %v617_v63  ;;  %v656_v4 = vpack.c.bf16 %v626_v36, %v618_v0 }
 0x26e   : > { %682 = vmatpush.bf16.msrb.mxu0 %v655_v3  ;;  %695 = vmatpush.bf16.msrb.mxu1 %v656_v4 }
 0x26f   : > { %v610_v6 = vpop.permute.xlu1 %609 }
 0x270   : > { %v613_v8 = vsel %vm445_vm7, %v610_v6, %v612_v5  ;;  %v614_v52 = vsel %vm445_vm7, %v612_v5, %v610_v6  ;;  %v604_v56 = vpop.permute.xlu0 %603 }
 0x271   : > { %v615_v55 = vmul.f32 %v614_v52, %v451_v13  ;;  %v616_v49 = vmul.f32 %v613_v8, %v452_v14  ;;  %v605_v57 = vsel %vm429_vm6, %v602_v61, %v604_v56  ;;  %v606_v58 = vsel %vm429_vm6, %v604_v56, %v602_v61 }
 0x272   : > { %v607_v9 = vmul.f32 %v606_v58, %v435_v11  ;;  %v608_v15 = vmul.f32 %v605_v57, %v436_v12 }
 0x274   : > { %v653_v16 = vpack.c.bf16 %v615_v55, %v607_v9  ;;  %v654_v17 = vpack.c.bf16 %v616_v49, %v608_v15 }
 0x276   : > { %683 = vmatpush.bf16.msrb.mxu0 %v653_v16  ;;  %696 = vmatpush.bf16.msrb.mxu1 %v654_v17 }
 0x277   : > { %v588_v18 = vpop.permute.xlu1 %587 }
 0x278   : > { %v586_v13 = vpop.permute.xlu0 %585 }
 0x279   : > { %v589_v10 = vsel %vm398_vm8, %v586_v13, %v588_v18  ;;  %v590_v14 = vsel %vm398_vm8, %v588_v18, %v586_v13 }
 0x27a   : > { %v591_v12 = vmul.f32 %v590_v14, %v403_v41  ;;  %v592_v25 = vmul.f32 %v589_v10, %v404_v43 }
 0x280   : > { %v596_v24 = vpop.permute.xlu0 %595 }
 0x281   : > { %v597_v11 = vsel %vm413_vm9, %v594_v19, %v596_v24  ;;  %v598_v7 = vsel %vm413_vm9, %v596_v24, %v594_v19 }
 0x282   : > { %v599_v26 = vmul.f32 %v598_v7, %v419_v44  ;;  %v600_v27 = vmul.f32 %v597_v11, %v420_v45 }
 0x284   : > { %v651_v28 = vpack.c.bf16 %v599_v26, %v591_v12  ;;  %v652_v29 = vpack.c.bf16 %v600_v27, %v592_v25 }
 0x286   : > { %684 = vmatpush.bf16.msrb.mxu0 %v651_v28  ;;  %697 = vmatpush.bf16.msrb.mxu1 %v652_v29 }
 0x289   : > { %821 = vmatmul.msk.bf16.vlgmr.msrb.gmra.mxu0 %vm547_vm10, %v661_v20  ;;  %822 = vmatmul.msk.bf16.vlgmr.msrb.gmra.mxu1 %vm547_vm10, %v661_v20 }
 0x2d5   : > { %v666_v37 = vpop.permute.xlu1 %665 }
 0x306   : > { %v686_v41 = vpop.f32.mrf.mxu0  ;;  %v699_v43 = vpop.f32.mrf.mxu1 }
 0x307   : > { %v687_v38 = vadd.f32 %v686_v41, %v666_v37  ;;  %v700_v44 = vadd.f32 %v699_v43, %v666_v37 }
 0x309   : > { %v703_v45 = vadd.f32 %v687_v38, %v1195_v1  ;;  %v704_v32 = vadd.f32 %v700_v44, %v1197_v2 }
 0x30b   : > { %v705_v33 = vmax.f32 %v703_v45, 0.0  ;;  %v706_v34 = vmax.f32 %v704_v32, 0.0 }
 0x30d   : > { %707 = vst [vmem:[%s340_s10] sm:$0xff] %v705_v33 }
 0x30e   : > { %708 = vst [vmem:[%s340_s10 + $0x8] sm:$0xff] %v706_v34  ;;  %v688_v42 = vpop.f32.mrf.mxu0  ;;  %v701_v46 = vpop.f32.mrf.mxu1 }
 0x30f   : > { %988 = shalt.err (!%p985_p9)
}
 0x310   : > { %836 = dma.vmem_to_hbm [thread:$0]  (%p1150_p13), %s724_s7, 256, %s726_s13, %s710_s12  }
 0x311 PF: > { %s737_s25 = sand.u32 1, %s1019_s27   ;;  %p1521_p10 = scmp.ge.s32.totalorder %s1031_s30, 2 }
 0x312   : > { %s738_s11 = scalar_lea.sflag [#allocation4], %s737_s25 }
 0x313   : > { %p847_p11 = pnand %p1521_p10, %p1155_p4 }
 0x315   : > { %p848_p0 = pneg %p847_p11 }
 0x317   : > { %1014 = dma.done.wait (%p848_p0), %s738_s11, 256  }
 0x318   : > { %1016 = vsyncadd (%p848_p0), %s738_s11, 4294967040  ;;  %s1522_s9 = sld [smem:[#allocation11_spill]]  ;;  %p22_p2 = scmp.ge.s32.totalorder %s1130_s19, 4  }
 0x319   : > { %s1523_s27 = smov %s1023_s28  ;;  %s1524_s28 = smov %s1027_s29 }
 0x31a   : > { %s1526_s30 = smov %s1130_s19  ;;  %24 = sbr.rel (!%p22_p2) target bundleno = 8 (0x8), region = 109 }
 0x31e   : > { %s1525_s29 = smov %s1522_s9 }
 0x31f   :  { %744 = vsyncpa [#allocation3], 1 }
 0x320   :  { %746 = vsyncpa [#allocation3 + $0x1], 1 }
 0x321   :  { %747 = vsyncpa [#allocation6], 1 }
 0x322   :  { %748 = vsyncpa [#allocation4], 1 }
 0x323   :  { %750 = vsyncpa [#allocation4 + $0x1], 1 }

</bundles_post_ra>
